<compile_context>
chip_gen: v7x
topology: tpu7x:2x2x1
jax: 0.10.0
libtpu: 0.0.40
codegen_flags: <defaults>
</compile_context>

<pallas_src>
import functools

import jax
import jax.numpy as jnp
from jax.experimental import pallas as pl
from jax.experimental.pallas import tpu as pltpu

_LANE = 128
# Total budget for pipelined buffers (2x input + 2x output + acc scratch).
# Leaves headroom under the 32 MiB scoped-VMEM limit on every generation
# (v5e/v6e: 128 MiB physical, v7x: 64 MiB physical / 32 MiB scoped default).
_VMEM_BUFFER_BUDGET = 20 * 1024 * 1024
_VMEM_LIMIT_BYTES = 32 * 1024 * 1024


def _round_up(x, m):
    return ((x + m - 1) // m) * m


def _gap_kernel_single(x_ref, o_ref, *, inv_hw):
    """Common path: whole H*W in one block -> direct row-mean, no scratch."""
    # f32 accumulation regardless of input dtype (matters on v5e: no bf16 VPU).
    s = jnp.sum(x_ref[...].astype(jnp.float32), axis=-1, keepdims=True)
    o_ref[...] = (s * inv_hw).astype(o_ref.dtype)


def _gap_kernel_tiled(x_ref, o_ref, acc_ref, *, inv_hw, chunks):
    """Rare path (huge H*W): lane-parallel partial sums across HW grid steps."""
    k = pl.program_id(1)

    x32 = x_ref[...].astype(jnp.float32)
    # Lane-parallel partial sums on the 4 VALU slots (static, tile-aligned
    # 128-lane slices); no per-step cross-lane reduce.
    partial = x32[:, 0:_LANE]
    for j in range(1, chunks):
        partial = partial + x32[:, j * _LANE:(j + 1) * _LANE]

    @pl.when(k == 0)
    def _():
        acc_ref[...] = partial

    @pl.when(k > 0)
    def _():
        acc_ref[...] += partial

    @pl.when(k == pl.num_programs(1) - 1)
    def _():
        # Single cross-lane (XLU) reduce, only at finalize.
        s = jnp.sum(acc_ref[...], axis=-1, keepdims=True)
        o_ref[...] = (s * inv_hw).astype(o_ref.dtype)


def _choose_tiles(nc, hw, itemsize):
    """Pick (tile_rows, tile_hw) against the real (lane-padded) VMEM footprint."""
    sub = max(8, 32 // itemsize)          # sublane multiple: 8 f32, 16 bf16, 32 int8
    padded_row_in = _round_up(hw, _LANE) * itemsize   # input bytes per row (lane padded)
    out_row = _LANE * itemsize            # (tile_rows, 1) output is lane-padded to 128
    acc_row = _LANE * 4                   # f32 accumulator row (tiled branch only)

    per_row_single = 2 * padded_row_in + 2 * out_row  # 2x in + 2x out buffers

    if sub * per_row_single <= _VMEM_BUFFER_BUDGET:
        # Common path: keep H*W whole in the block (equals the full array dim,
        # so the 128-lane divisibility rule holds even for HW = 49 / 196).
        tile_hw = hw
        tile_rows = (_VMEM_BUFFER_BUDGET // per_row_single) // sub * sub

        # Keep >= 4 row blocks when N*C allows it (v7x megacore + pipelining).
        rows_cap = (nc // 4) // sub * sub
        if rows_cap < sub:
            rows_cap = _round_up(nc, sub)
        tile_rows = max(sub, min(tile_rows, rows_cap, _round_up(nc, sub)))
        return tile_rows, tile_hw

    # Huge spatial extent: tile H*W too (multiple of 128 lanes) and accumulate
    # lane-parallel partial sums across HW grid steps.
    tile_rows = max(sub, min(_round_up(nc, sub), 256))
    fixed = tile_rows * (2 * out_row + acc_row)
    tile_hw = ((_VMEM_BUFFER_BUDGET - fixed)
               // (2 * tile_rows * itemsize)) // _LANE * _LANE
    tile_hw = max(_LANE, min(tile_hw, _round_up(hw, _LANE)))
    return tile_rows, tile_hw


def global_avg_pool2d(x):
    """x: (N, C, H, W) -> (N, C, 1, 1), mean over H and W."""
    if not jnp.issubdtype(x.dtype, jnp.floating):
        raise TypeError(f"avg_pool2d expects a floating dtype, got {x.dtype}")

    N, C, H, W = x.shape
    nc, hw = N * C, H * W
    x2d = x.reshape(nc, hw)

    itemsize = jnp.dtype(x.dtype).itemsize
    tile_rows, tile_hw = _choose_tiles(nc, hw, itemsize)
    row_blocks = pl.cdiv(nc, tile_rows)   # ragged last block: garbage rows only
    inv_hw = 1.0 / float(hw)              # divisor is always the TRUE H*W

    if tile_hw == hw:
        # Common path: single HW step, no accumulator, no padding anywhere.
        out2d = pl.pallas_call(
            functools.partial(_gap_kernel_single, inv_hw=inv_hw),
            out_shape=jax.ShapeDtypeStruct((nc, 1), x.dtype),
            grid_spec=pltpu.PrefetchScalarGridSpec(
                num_scalar_prefetch=0,
                grid=(row_blocks,),
                in_specs=[pl.BlockSpec((tile_rows, hw), lambda i: (i, 0))],
                out_specs=pl.BlockSpec((tile_rows, 1), lambda i: (i, 0)),
            ),
            compiler_params=pltpu.CompilerParams(
                dimension_semantics=("parallel",),
                vmem_limit_bytes=_VMEM_LIMIT_BYTES,
            ),
        )(x2d)
    else:
        # Rare path: tile H*W.  Zero-pad ONLY the HW (reduction) axis; rows
        # stay unpadded/ragged.  Zero columns add 0 to the sums while the
        # divisor stays the true H*W, so the mean is exact.
        hw_pad = _round_up(hw, tile_hw)
        if hw_pad != hw:
            x2d = jnp.pad(x2d, ((0, 0), (0, hw_pad - hw)))
        hw_blocks = hw_pad // tile_hw

        out2d = pl.pallas_call(
            functools.partial(_gap_kernel_tiled, inv_hw=inv_hw,
                              chunks=tile_hw // _LANE),
            out_shape=jax.ShapeDtypeStruct((nc, 1), x.dtype),
            grid_spec=pltpu.PrefetchScalarGridSpec(
                num_scalar_prefetch=0,
                grid=(row_blocks, hw_blocks),
                in_specs=[
                    pl.BlockSpec((tile_rows, tile_hw), lambda i, k: (i, k)),
                ],
                # Output block fixed across the HW axis -> resident target,
                # written once at the last HW step.
                out_specs=pl.BlockSpec((tile_rows, 1), lambda i, k: (i, 0)),
                scratch_shapes=[pltpu.VMEM((tile_rows, _LANE), jnp.float32)],
            ),
            compiler_params=pltpu.CompilerParams(
                dimension_semantics=("parallel", "arbitrary"),
                vmem_limit_bytes=_VMEM_LIMIT_BYTES,
            ),
        )(x2d)

    return out2d.reshape(N, C, 1, 1)


if __name__ == "__main__":
    key = jax.random.PRNGKey(0)
    x = jax.random.normal(key, (2, 4, 16, 16), dtype=jnp.float32)

    out = global_avg_pool2d(x)
    jax.block_until_ready(out)

    # Sanity check against plain-JAX reference (same semantics as F.avg_pool2d
    # with kernel_size = full spatial extent).
    ref = jnp.mean(x, axis=(2, 3), keepdims=True)
    assert out.shape == (2, 4, 1, 1), out.shape
    assert jnp.allclose(out, ref, atol=1e-5, rtol=1e-5)

    # Extra check: ragged N*C (not a multiple of the 8-row sublane group).
    x2 = jax.random.normal(jax.random.PRNGKey(1), (3, 7, 7, 7), dtype=jnp.float32)
    out2 = global_avg_pool2d(x2)
    jax.block_until_ready(out2)
    ref2 = jnp.mean(x2, axis=(2, 3), keepdims=True)
    assert out2.shape == (3, 7, 1, 1), out2.shape
    assert jnp.allclose(out2, ref2, atol=1e-5, rtol=1e-5)

    print("KERNEL_OK")
</pallas_src>

<mosaic_0001>
module attributes {stable_mosaic.version = 11 : i64} {
  func.func @_gap_kernel_single(%arg0: i32, %arg1: memref<8x256xf32, #tpu.memory_space<vmem>>, %arg2: memref<8x1xf32, #tpu.memory_space<vmem>>) attributes {dimension_semantics = [#tpu.dimension_semantics<parallel>], iteration_bounds = array<i64: 1>, scalar_prefetch = 0 : i64, scratch_operands = 0 : i64, tpu.core_type = #tpu.core_type<tc>, window_params = [{transform_indices = @transform_0, window_bounds = array<i64: 8, 256>}, {transform_indices = @transform_1, window_bounds = array<i64: 8, 1>}]} {
    %c0 = arith.constant 0 : index
    %c0_0 = arith.constant 0 : index
    %0 = vector.load %arg1[%c0, %c0_0] : memref<8x256xf32, #tpu.memory_space<vmem>>, vector<8x256xf32>
    %cst = arith.constant dense<0.000000e+00> : vector<8xf32>
    %1 = vector.multi_reduction <add>, %0, %cst [1] : vector<8x256xf32> to vector<8xf32>
    %2 = vector.shape_cast %1 : vector<8xf32> to vector<8x1xf32>
    %cst_1 = arith.constant 3.906250e-03 : f32
    %3 = vector.broadcast %cst_1 : f32 to vector<8x1xf32>
    %4 = arith.mulf %2, %3 : vector<8x1xf32>
    %c0_2 = arith.constant 0 : index
    %c0_3 = arith.constant 0 : index
    %5 = vector.load %arg2[%c0_2, %c0_3] : memref<8x1xf32, #tpu.memory_space<vmem>>, vector<8x1xf32>
    tpu.vector_store %arg2[%c0_2, %c0_3], %4 {strides = array<i32>} : memref<8x1xf32, #tpu.memory_space<vmem>>, vector<8x1xf32>,
    return
  }
  func.func @transform_0(%arg0: i32) -> (i32, i32) {
    %c0_i32 = arith.constant 0 : i32
    %c0_i32_0 = arith.constant 0 : i32
    return %arg0, %c0_i32 : i32, i32
  }
  func.func @transform_1(%arg0: i32) -> (i32, i32) {
    %c0_i32 = arith.constant 0 : i32
    %c0_i32_0 = arith.constant 0 : i32
    return %arg0, %c0_i32 : i32, i32
  }
}

</mosaic_0001>

<bundles_post_ra>
// kernel: tpu_custom_call.1
= control target key start
LH: loop header
LB: loop body
LE: loop exit
PB: predicated region body
PF: predicated region fallthrough
CT: control target
= control target key end

     0   :  { %6 = vsyncpa [#allocation3], 0  ;;  %s58_s6 = smov [#allocation2]   ;;  %s84_s0 = inlined_call_operand.hbm [shape: f32[8,256], index: 0, kind: input, shape index: {}]   ;;  %s85_s1 = inlined_call_operand.vmem [shape: f32[8,1], index: 1, kind: output, shape index: {}]  }
   0x1   :  { %s13_s7 = sshll.u32 %s58_s6, 4  ;;  %s34_s10 = scalar_lea.hbm %s84_s0, 256  ;;  %s14_s7 = int_to_ptr.vmem [resolvable:$true] %s13_s7 }
   0x2   :  { %p35_p0 = scmp.ne.s32.totalorder %s84_s0, %s34_s10  ;;  %p38_p1 = scmp.lt.u32.totalorder %s34_s10, %s84_s0 }
   0x4   :  { %p40_p2 = pnand %p38_p1, %p35_p0 }
   0x6   :  { %43 = shalt.err (!%p40_p2)
}
   0x7   :  { %s44_s15 = scalar_lea.vmem %s14_s7, 256  ;;  %p49_p4 = scmp.lt.s32.totalorder %s14_s7, %s14_s7 }
   0x8   :  { %p45_p3 = scmp.ne.s32.totalorder %s14_s7, %s44_s15  ;;  %p50_p5 = scmp.lt.s32.totalorder %s44_s15, %s44_s15 }
   0xa   :  { %p51_p6 = por %p50_p5, %p49_p4 }
   0xc   :  { %p52_p7 = pnand %p51_p6, %p45_p3 }
   0xe   :  { %55 = shalt.err (!%p52_p7)
}
   0xf   :  { %16 = dma.hbm_to_vmem [thread:$0]  %s84_s0, 256, %s14_s7, [#allocation3]  }
  0x10   :  { %56 = dma.done.wait [#allocation3], 256  }
  0x11   :  { %57 = vsyncadd [#allocation3], 4294967040  ;;  %v20_v0 = vld [vmem:[#allocation2] sm:$0xff]  ;;  %v21_v1 = vld [vmem:[#allocation2 + $0x8] sm:$0xff]  ;;  %vm26_vm0 = vcmask 7168  }
  0x12   :  { %v22_v2 = vadd.f32 %v21_v1, %v20_v0 }
  0x14   :  { %23 = vadd.xlane.f32.xlu0 %v22_v2 }
  0xa1   :  { %v24_v3 = vpop.xlane.xlu0 %23 }
  0xa2   :  { %v25_v4 = vmul.f32 0.00390625, %v24_v3 }
  0xa4   :  { %27 = vst.msk [vmem:[%s85_s1] sm:$0xff] %vm26_vm0, %v25_v4 }
  0xa5   :  { %32 = vsyncpa [#allocation3], 1 }

</bundles_post_ra>
